<compile_context>
chip_gen: v7x
topology: tpu7x:2x2x1
jax: 0.10.0
libtpu: 0.0.40
codegen_flags: <defaults>
</compile_context>

<pallas_src>
import functools

import jax
import jax.numpy as jnp
from jax.experimental import pallas as pl
from jax.experimental.pallas import tpu as pltpu


# --------------------------- tile-size selection ---------------------------- #
def _pick_lane_tile(c, hw, vmem_budget_bytes=10 * 1024 * 1024, max_tile=8192):
    # kernel-1 per-lane footprint: double-buffered I/O blocks (logits, tgt,
    # mp, nll) + in-kernel f32 temporaries (~3 C-row arrays).  Stays well under
    # the 16 MiB scoped-VMEM default of the smallest generation (v5e) and the
    # v7x 64 MiB physical cap.
    bytes_per_lane = 4 * (2 * c + 6) + 4 * (3 * c)
    lt = vmem_budget_bytes // bytes_per_lane
    lt = (lt // 128) * 128
    hw_pad128 = ((hw + 127) // 128) * 128
    lt = max(128, min(lt, max_tile, hw_pad128))
    return int(lt)


# ----------------------------- Kernel 1 ------------------------------------ #
def _ohem_pixel_kernel(tgt_ref, logits_ref, mp_ref, nll_ref, *, ignore_label, hw):
    logits = logits_ref[0].astype(jnp.float32)          # (C, TN)
    tgt = tgt_ref[0]                                     # (1, TN) int32
    c, tn = logits.shape

    # ragged-tail mask: input blocks may extend past hw; outputs are padded.
    lane = jax.lax.broadcasted_iota(jnp.int32, (1, tn), 1)
    in_bounds = (pl.program_id(1) * tn + lane) < hw

    valid = (tgt != ignore_label) & in_bounds
    t = jnp.where(valid, tgt, 0)                         # clamp ignored/tail -> 0

    # numerically-stable softmax / log-softmax over the class (sublane) axis
    m = jnp.max(logits, axis=0, keepdims=True)           # (1, TN)
    e = jnp.exp(logits - m)                               # (C, TN)
    sum_e = jnp.sum(e, axis=0, keepdims=True)             # (1, TN)

    onehot = jax.lax.broadcasted_iota(jnp.int32, (c, tn), 0) == t
    logit_t = jnp.sum(jnp.where(onehot, logits, 0.0), axis=0, keepdims=True)
    e_t = jnp.sum(jnp.where(onehot, e, 0.0), axis=0, keepdims=True)

    prob_t = e_t / sum_e                                  # softmax prob of target class
    nll = (jnp.log(sum_e) + m) - logit_t                  # -log_softmax[target]

    # 2.0 encodes "invalid / out-of-bounds": never kept in kernel 2 (thr <= 1.5)
    # and clamped to 1.0 in the wrapper before the threshold selection, which
    # reproduces torch's prob.masked_fill_(~valid, 1).
    mp_ref[0] = jnp.where(valid, prob_t, 2.0)
    nll_ref[0] = jnp.where(valid, nll, 0.0)


# ----------------------------- Kernel 2 ------------------------------------ #
def _ohem_reduce_kernel(thr_ref, mp_ref, nll_ref, sum_ref, cnt_ref,
                        psum_ref, pcnt_ref):
    i = pl.program_id(1)

    @pl.when(i == 0)
    def _():
        psum_ref[...] = jnp.zeros_like(psum_ref)
        pcnt_ref[...] = jnp.zeros_like(pcnt_ref)

    thr = thr_ref[0]                 # effective threshold, SMEM scalar
    mp = mp_ref[0]                   # (1, TN)
    nll = nll_ref[0]                 # (1, TN)  (already zeroed for invalid)

    keep = (mp <= thr).astype(jnp.float32)
    psum_ref[...] += nll * keep      # per-lane partials: pure VPU, hides under DMA
    pcnt_ref[...] += keep

    @pl.when(i == pl.num_programs(1) - 1)
    def _():
        sum_ref[0] = jnp.sum(psum_ref[...], keepdims=True)   # (1, 1)
        cnt_ref[0] = jnp.sum(pcnt_ref[...], keepdims=True)   # (1, 1)


# ------------------------------ Wrapper ------------------------------------ #
def prob_ohem_cross_entropy_2d(pred, target, *, ignore_label, thresh=0.6,
                               min_kept=256, lane_tile=None):
    b, c, h, w = pred.shape
    hw = h * w

    if lane_tile is None:
        lane_tile = _pick_lane_tile(c, hw)
    n_blk = pl.cdiv(hw, lane_tile)
    hw_pad = n_blk * lane_tile

    # pure views, no HBM transpose / pad / dtype-upcast copies
    logits = pred.reshape(b, c, hw)
    tgt = target.reshape(b, 1, hw).astype(jnp.int32)

    # --- kernel 1: per-pixel softmax / gather / nll ---
    mp, nll = pl.pallas_call(
        functools.partial(_ohem_pixel_kernel, ignore_label=ignore_label, hw=hw),
        out_shape=(jax.ShapeDtypeStruct((b, 1, hw_pad), jnp.float32),
                   jax.ShapeDtypeStruct((b, 1, hw_pad), jnp.float32)),
        grid=(b, n_blk),
        in_specs=[pl.BlockSpec((1, 1, lane_tile), lambda bb, i: (bb, 0, i)),
                  pl.BlockSpec((1, c, lane_tile), lambda bb, i: (bb, 0, i))],
        out_specs=(pl.BlockSpec((1, 1, lane_tile), lambda bb, i: (bb, 0, i)),
                   pl.BlockSpec((1, 1, lane_tile), lambda bb, i: (bb, 0, i))),
        compiler_params=pltpu.CompilerParams(
            dimension_semantics=("parallel", "parallel")),
    )(tgt, logits)

    # --- OHEM threshold selection (glue) ---
    # TODO(synk): k-th smallest selection has no clean Pallas TPU primitive;
    # done with jax.lax.top_k (O(N log k) instead of a full sort).
    mp_flat = mp.reshape(-1)
    num_valid = jnp.sum((mp_flat <= 1.5).astype(jnp.float32))

    if min_kept > 0:
        # invalid / tail pixels -> 1.0, matching torch's masked_fill(~valid, 1);
        # extra padded 1.0s never change the k-th smallest (all real values <= 1).
        sort_vals = jnp.minimum(mp_flat, 1.0)
        k = min(int(sort_vals.shape[0]), int(min_kept))
        neg_top, _ = jax.lax.top_k(-sort_vals, k)
        kth = -neg_top[k - 1]
        threshold = jnp.maximum(kth, jnp.float32(thresh))
    else:
        threshold = jnp.float32(thresh)

    # OHEM applies only when num_valid > 0 and min_kept <= num_valid (PyTorch).
    apply_ohem = (num_valid >= jnp.float32(min_kept)) & (num_valid > 0)
    # effective threshold: <= 1.0 when OHEM applies, 1.5 otherwise (keep = valid).
    eff_thr = jnp.where(apply_ohem, threshold,
                        jnp.float32(1.5)).reshape(1).astype(jnp.float32)

    # --- kernel 2: keep-mask + masked mean reduction (per-batch partials) ---
    loss_sums, cnts = pl.pallas_call(
        _ohem_reduce_kernel,
        out_shape=(jax.ShapeDtypeStruct((b, 1, 1), jnp.float32),
                   jax.ShapeDtypeStruct((b, 1, 1), jnp.float32)),
        grid=(b, n_blk),
        in_specs=[pl.BlockSpec(memory_space=pltpu.MemorySpace.SMEM),
                  pl.BlockSpec((1, 1, lane_tile), lambda bb, i: (bb, 0, i)),
                  pl.BlockSpec((1, 1, lane_tile), lambda bb, i: (bb, 0, i))],
        out_specs=(pl.BlockSpec((1, 1, 1), lambda bb, i: (bb, 0, 0)),
                   pl.BlockSpec((1, 1, 1), lambda bb, i: (bb, 0, 0))),
        scratch_shapes=[pltpu.VMEM((1, lane_tile), jnp.float32),
                        pltpu.VMEM((1, lane_tile), jnp.float32)],
        compiler_params=pltpu.CompilerParams(
            dimension_semantics=("parallel", "arbitrary")),
    )(eff_thr, mp, nll)

    # CrossEntropyLoss(reduction='mean', ignore_index=ignore_label)
    return jnp.sum(loss_sums) / jnp.sum(cnts)


# --------------------------- pure-JAX reference ----------------------------- #
def _reference(pred, target, *, ignore_label, thresh, min_kept):
    b, c, h, w = pred.shape
    tgt = target.reshape(-1).astype(jnp.int32)
    valid = tgt != ignore_label
    t = jnp.where(valid, tgt, 0)
    num_valid = jnp.sum(valid)
    logits = jnp.transpose(pred, (1, 0, 2, 3)).reshape(c, -1).astype(jnp.float32)
    prob = jax.nn.softmax(logits, axis=0)
    prob = jnp.where(valid[None, :], prob, 1.0)
    idx = jnp.arange(t.shape[0])
    mask_prob = prob[t, idx]
    if min_kept > 0:
        kth = jnp.sort(mask_prob)[min(t.shape[0], min_kept) - 1]
        threshold = jnp.where(kth > thresh, kth, jnp.float32(thresh))
    else:
        threshold = jnp.float32(thresh)
    apply = (num_valid >= min_kept) & (num_valid > 0)
    kept = jnp.where(apply, mask_prob <= threshold, True)
    keep = (valid & kept).astype(jnp.float32)
    logp = jax.nn.log_softmax(logits, axis=0)
    nll = -logp[t, idx]
    return jnp.sum(nll * keep) / jnp.sum(keep)


if __name__ == "__main__":
    IGNORE = 255
    THRESH = 0.6
    MIN_KEPT = 256

    B, C, H, W = 2, 4, 16, 16   # N = 512 pixels
    key = jax.random.PRNGKey(0)
    k1, k2, k3 = jax.random.split(key, 3)

    pred = jax.random.normal(k1, (B, C, H, W), dtype=jnp.float32) * 2.0
    labels = jax.random.randint(k2, (B, H, W), 0, C, dtype=jnp.int32)
    ignore_mask = jax.random.uniform(k3, (B, H, W)) < 0.1
    target = jnp.where(ignore_mask, IGNORE, labels).astype(jnp.int32)

    loss = prob_ohem_cross_entropy_2d(
        pred, target, ignore_label=IGNORE, thresh=THRESH, min_kept=MIN_KEPT)
    loss = jax.block_until_ready(loss)

    ref = jax.block_until_ready(
        _reference(pred, target, ignore_label=IGNORE, thresh=THRESH,
                   min_kept=MIN_KEPT))

    assert jnp.isfinite(loss), "loss is not finite"
    assert jnp.allclose(loss, ref, rtol=1e-4, atol=1e-4), (loss, ref)
    print("KERNEL_OK")
</pallas_src>

<mosaic_0001>
module attributes {stable_mosaic.version = 11 : i64} {
  func.func @_ohem_pixel_kernel(%arg0: i32, %arg1: i32, %arg2: memref<1x1x256xi32, #tpu.memory_space<vmem>>, %arg3: memref<1x4x256xf32, #tpu.memory_space<vmem>>, %arg4: memref<1x1x256xf32, #tpu.memory_space<vmem>>, %arg5: memref<1x1x256xf32, #tpu.memory_space<vmem>>) attributes {dimension_semantics = [#tpu.dimension_semantics<parallel>, #tpu.dimension_semantics<parallel>], iteration_bounds = array<i64: 2, 1>, scalar_prefetch = 0 : i64, scratch_operands = 0 : i64, tpu.core_type = #tpu.core_type<tc>, window_params = [{transform_indices = @transform_0, window_bounds = array<i64: 1, 1, 256>}, {transform_indices = @transform_1, window_bounds = array<i64: 1, 4, 256>}, {transform_indices = @transform_2, window_bounds = array<i64: 1, 1, 256>}, {transform_indices = @transform_3, window_bounds = array<i64: 1, 1, 256>}]} {
    %c0 = arith.constant 0 : index
    %c0_0 = arith.constant 0 : index
    %c0_1 = arith.constant 0 : index
    %0 = vector.load %arg3[%c0, %c0_0, %c0_1] : memref<1x4x256xf32, #tpu.memory_space<vmem>>, vector<1x4x256xf32>
    %1 = vector.shape_cast %0 : vector<1x4x256xf32> to vector<4x256xf32>
    %c0_2 = arith.constant 0 : index
    %c0_3 = arith.constant 0 : index
    %c0_4 = arith.constant 0 : index
    %2 = vector.load %arg2[%c0_2, %c0_3, %c0_4] : memref<1x1x256xi32, #tpu.memory_space<vmem>>, vector<1x1x256xi32>
    %3 = vector.shape_cast %2 : vector<1x1x256xi32> to vector<1x256xi32>
    %4 = tpu.iota {dimensions = array<i32: 1>} : vector<1x256xi32>
    %c256_i32 = arith.constant 256 : i32
    %5 = arith.muli %arg1, %c256_i32 : i32
    %6 = vector.broadcast %5 : i32 to vector<1x256xi32>
    %7 = arith.addi %6, %4 : vector<1x256xi32>
    %c256_i32_5 = arith.constant 256 : i32
    %8 = vector.broadcast %c256_i32_5 : i32 to vector<1x256xi32>
    %9 = arith.cmpi slt, %7, %8 : vector<1x256xi32>
    %c255_i32 = arith.constant 255 : i32
    %10 = vector.broadcast %c255_i32 : i32 to vector<1x256xi32>
    %11 = arith.cmpi ne, %3, %10 : vector<1x256xi32>
    %12 = arith.andi %11, %9 : vector<1x256xi1>
    %c0_i32 = arith.constant 0 : i32
    %13 = vector.broadcast %c0_i32 : i32 to vector<1x256xi32>
    %14 = arith.select %12, %3, %13 : vector<1x256xi1>, vector<1x256xi32>
    %cst = arith.constant dense<0xFF800000> : vector<256xf32>
    %15 = vector.multi_reduction <maximumf>, %1, %cst [0] : vector<4x256xf32> to vector<256xf32>
    %16 = vector.shape_cast %15 : vector<256xf32> to vector<1x256xf32>
    %17 = vector.broadcast %16 : vector<1x256xf32> to vector<4x256xf32>
    %18 = arith.subf %1, %17 : vector<4x256xf32>
    %19 = math.exp %18 : vector<4x256xf32>
    %cst_6 = arith.constant dense<0.000000e+00> : vector<256xf32>
    %20 = vector.multi_reduction <add>, %19, %cst_6 [0] : vector<4x256xf32> to vector<256xf32>
    %21 = vector.shape_cast %20 : vector<256xf32> to vector<1x256xf32>
    %22 = tpu.iota {dimensions = array<i32: 0>} : vector<4x256xi32>
    %23 = vector.broadcast %14 : vector<1x256xi32> to vector<4x256xi32>
    %24 = arith.cmpi eq, %22, %23 : vector<4x256xi32>
    %cst_7 = arith.constant 0.000000e+00 : f32
    %25 = vector.broadcast %cst_7 : f32 to vector<4x256xf32>
    %26 = arith.select %24, %1, %25 : vector<4x256xi1>, vector<4x256xf32>
    %cst_8 = arith.constant dense<0.000000e+00> : vector<256xf32>
    %27 = vector.multi_reduction <add>, %26, %cst_8 [0] : vector<4x256xf32> to vector<256xf32>
    %28 = vector.shape_cast %27 : vector<256xf32> to vector<1x256xf32>
    %cst_9 = arith.constant 0.000000e+00 : f32
    %29 = vector.broadcast %cst_9 : f32 to vector<4x256xf32>
    %30 = arith.select %24, %19, %29 : vector<4x256xi1>, vector<4x256xf32>
    %cst_10 = arith.constant dense<0.000000e+00> : vector<256xf32>
    %31 = vector.multi_reduction <add>, %30, %cst_10 [0] : vector<4x256xf32> to vector<256xf32>
    %32 = vector.shape_cast %31 : vector<256xf32> to vector<1x256xf32>
    %33 = arith.divf %32, %21 : vector<1x256xf32>
    %34 = math.log %21 : vector<1x256xf32>
    %35 = arith.addf %34, %16 : vector<1x256xf32>
    %36 = arith.subf %35, %28 : vector<1x256xf32>
    %cst_11 = arith.constant 2.000000e+00 : f32
    %37 = vector.broadcast %cst_11 : f32 to vector<1x256xf32>
    %38 = arith.select %12, %33, %37 : vector<1x256xi1>, vector<1x256xf32>
    %c0_12 = arith.constant 0 : index
    %c0_13 = arith.constant 0 : index
    %c0_14 = arith.constant 0 : index
    %39 = vector.load %arg4[%c0_12, %c0_13, %c0_14] : memref<1x1x256xf32, #tpu.memory_space<vmem>>, vector<1x1x256xf32>
    %40 = vector.shape_cast %39 : vector<1x1x256xf32> to vector<1x256xf32>
    %41 = vector.shape_cast %38 : vector<1x256xf32> to vector<1x1x256xf32>
    tpu.vector_store %arg4[%c0_12, %c0_13, %c0_14], %41 {strides = array<i32>} : memref<1x1x256xf32, #tpu.memory_space<vmem>>, vector<1x1x256xf32>,
    %cst_15 = arith.constant 0.000000e+00 : f32
    %42 = vector.broadcast %cst_15 : f32 to vector<1x256xf32>
    %43 = arith.select %12, %36, %42 : vector<1x256xi1>, vector<1x256xf32>
    %c0_16 = arith.constant 0 : index
    %c0_17 = arith.constant 0 : index
    %c0_18 = arith.constant 0 : index
    %44 = vector.load %arg5[%c0_16, %c0_17, %c0_18] : memref<1x1x256xf32, #tpu.memory_space<vmem>>, vector<1x1x256xf32>
    %45 = vector.shape_cast %44 : vector<1x1x256xf32> to vector<1x256xf32>
    %46 = vector.shape_cast %43 : vector<1x256xf32> to vector<1x1x256xf32>
    tpu.vector_store %arg5[%c0_16, %c0_17, %c0_18], %46 {strides = array<i32>} : memref<1x1x256xf32, #tpu.memory_space<vmem>>, vector<1x1x256xf32>,
    return
  }
  func.func @transform_0(%arg0: i32, %arg1: i32) -> (i32, i32, i32) {
    %c0_i32 = arith.constant 0 : i32
    %c0_i32_0 = arith.constant 0 : i32
    return %arg0, %c0_i32, %arg1 : i32, i32, i32
  }
  func.func @transform_1(%arg0: i32, %arg1: i32) -> (i32, i32, i32) {
    %c0_i32 = arith.constant 0 : i32
    %c0_i32_0 = arith.constant 0 : i32
    return %arg0, %c0_i32, %arg1 : i32, i32, i32
  }
  func.func @transform_2(%arg0: i32, %arg1: i32) -> (i32, i32, i32) {
    %c0_i32 = arith.constant 0 : i32
    %c0_i32_0 = arith.constant 0 : i32
    return %arg0, %c0_i32, %arg1 : i32, i32, i32
  }
  func.func @transform_3(%arg0: i32, %arg1: i32) -> (i32, i32, i32) {
    %c0_i32 = arith.constant 0 : i32
    %c0_i32_0 = arith.constant 0 : i32
    return %arg0, %c0_i32, %arg1 : i32, i32, i32
  }
}

</mosaic_0001>

<bundles_post_ra>
// kernel: tpu_custom_call.1
= control target key start
LH: loop header
LB: loop body
LE: loop exit
PB: predicated region body
PF: predicated region fallthrough
CT: control target
= control target key end

     0   :  { %9 = vsyncpa [#allocation3], 0  ;;  %s1245_s0 = inlined_call_operand.hbm [shape: s32[2,1,256], index: 0, kind: input, shape index: {}]   ;;  %s1246_s1 = inlined_call_operand.hbm [shape: f32[2,4,256], index: 1, kind: input, shape index: {}]   ;;  %s1247_s2 = inlined_call_operand.hbm [shape: f32[2,1,256], index: 2, kind: output, shape index: {0}]   ;;  %s1248_s3 = inlined_call_operand.hbm [shape: f32[2,1,256], index: 3, kind: output, shape index: {1}]  }
   0x1   :  { %11 = vsyncpa [#allocation3 + $0x1], 0 }
   0x2   :  { %12 = vsyncpa [#allocation6], 0 }
   0x3   :  { %14 = vsyncpa [#allocation6 + $0x1], 0 }
   0x4   :  { %15 = vsyncpa [#allocation4], 0 }
   0x5   :  { %17 = vsyncpa [#allocation4 + $0x1], 0 }
   0x6   :  { %18 = vsyncpa [#allocation9], 0 }
   0x7   :  { %20 = vsyncpa [#allocation9 + $0x1], 0  ;;  %s939_s12 = smov 0   ;;  %s941_s13 = smov 0  }
   0x8   :  { %s943_s14 = smov 0   ;;  %s945_s15 = smov 0  }
   0x9   :  { %s947_s16 = smov 0   ;;  %s949_s17 = smov 0  }
   0xa LB: > { %s621_s18 = sadd.s32 4294967295, %s911_s17   ;;  %s622_s19 = sadd.s32 4294967294, %s911_s17   ;;  %s911_s17 = sphi %s949_s17, %s26_s17   ;;  %s907_s16 = sphi %s947_s16, %s1272_s16   ;;  %s903_s15 = sphi %s945_s15, %s1271_s15   ;;  %s899_s14 = sphi %s943_s14, %s1270_s14   ;;  %s895_s13 = sphi %s941_s13, %s1269_s13   ;;  %s891_s12 = sphi %s939_s12, %s1268_s12  }
   0xb   : > { %s38_s20 = sadd.s32 1, %s907_s16  ;;  %s47_s21 = sadd.s32 1, %s899_s14 }
   0xc   : > { %p40_p0 = scmp.ge.s32.totalorder %s38_s20, 2  ;;  %p54_p1 = scmp.ne.s32.totalorder %s899_s14, %s895_s13 }
   0xd   : > { %p55_p2 = scmp.eq.s32.totalorder %s911_s17, 0  ;;  %p60_p3 = scmp.ne.s32.totalorder %s895_s13, %s891_s12 }
   0xe   : > { %s1274_s20 = smov (%p40_p0, %s38_s20), 0  ;;  %p61_p5 = scmp.eq.s32.totalorder %s621_s18, 0 }
   0xf   : > { %p980_p4 = por %p55_p2, %p54_p1  ;;  %s42_s23 = ssub.s32 %s907_s16, %s1274_s20 }
  0x10   : > { %p114_p6 = scmp.eq.s32.totalorder %s621_s18, 1  ;;  %p45_p7 = scmp.eq.s32.totalorder %s42_s23, 0 }
  0x11   : > { %p986_p8 = por %p61_p5, %p60_p3  ;;  %p120_p10 = scmp.eq.s32.totalorder %s622_s19, 1 }
  0x12   : > { %p990_p9 = por %p114_p6, %p54_p1  ;;  %p670_p13 = scmp.lt.s32.totalorder %s911_s17, 2 }
  0x13   : > { %s1252_s24 = scalar_select %p986_p8, 1, 0 }
  0x14   : > { %s1253_s25 = scalar_select %p990_p9, 1, 0 }
  0x15   : > { %s995_s26 = scalar_select %p45_p7, %s899_s14, %s47_s21  }
  0x16   : > { %p997_p11 = por %p120_p10, %p60_p3  ;;  %s1004_s28 = sand.u32 1, %s899_s14  }
  0x17   : > { %s625_s29 = sshll.u32 %s1004_s28, 1  ;;  %s644_s30 = sshll.u32 %s907_s16, 5 }
  0x18   : > { %s1254_s27 = scalar_select %p997_p11, 1, 0 }
  0x19   : > { %s1011_s6 = scalar_lea.hbm %s1245_s0, %s644_s30  ;;  %s172_s7 = scalar_lea.vmem [#allocation2], %s625_s29 }
  0x1a   : > { %s182_s8 = sshll.u32 %s172_s7, 4  ;;  %p1017_p0 = pnand %p670_p13, %p980_p4  ;;  %s1013_s8 = int_to_ptr.vmem [resolvable:$true] %s182_s8 }
  0x1b   : > { %s169_s10 = scalar_lea.sflag [#allocation3], %s1004_s28  ;;  %s733_s11 = scalar_lea.hbm %s1011_s6, 32 }
  0x1c   : > { %p734_p3 = scmp.ne.s32.totalorder %s1011_s6, %s733_s11  ;;  %p735_p5 = pneg %p1017_p0 }
  0x1d   : > { %s738_s21 = scalar_lea.hbm %s1245_s0, 64  ;;  %p739_p4 = scmp.lt.u32.totalorder %s1011_s6, %s1245_s0 }
  0x1e   : > { %p736_p6 = pnand %p735_p5, %p734_p3  ;;  %p740_p10 = scmp.lt.u32.totalorder %s738_s21, %s733_s11 }
  0x1f   : > { %p742_p12 = scmp.lt.u32.totalorder %s733_s11, %s1011_s6 }
  0x20   : > { %p737_p7 = pneg %p736_p6  ;;  %p741_p13 = por %p740_p10, %p739_p4 }
  0x22   : > { %p743_p1 = por %p742_p12, %p741_p13 }
  0x24   : > { %p744_p2 = pnand %p743_p1, %p737_p7 }
  0x26   : > { %747 = shalt.err (!%p744_p2)
}
  0x27   : > { %s748_s29 = scalar_lea.vmem %s1013_s8, 32  ;;  %s913_s30 = smov [#allocation2]  }
  0x28   : > { %p749_p3 = scmp.ne.s32.totalorder %s1013_s8, %s748_s29  ;;  %s753_s4 = sshll.u32 %s913_s30, 4  ;;  %s754_s4 = int_to_ptr.vmem [resolvable:$false] %s753_s4 }
  0x29   : > { %s755_s5 = scalar_lea.vmem %s754_s4, 64  ;;  %p756_p9 = scmp.lt.s32.totalorder %s1013_s8, %s754_s4 }
  0x2a   : > { %p751_p6 = pnand %p749_p3, %p735_p5  ;;  %p757_p4 = scmp.lt.s32.totalorder %s755_s5, %s748_s29 }
  0x2c   : > { %p752_p11 = pneg %p751_p6  ;;  %p758_p10 = por %p757_p4, %p756_p9 }
  0x2e   : > { %p759_p12 = pnand %p758_p10, %p752_p11 }
  0x30   : > { %762 = shalt.err (!%p759_p12)
}
  0x31   : > { %659 = dma.hbm_to_vmem [thread:$0]  (!%p1017_p0), %s1011_s6, 32, %s1013_s8, %s169_s10  }
  0x32   : > { %p1256_p1 = scmp.lt.s32.totalorder %s911_s17, 3  ;;  %p1257_p2 = scmp.ge.s32.totalorder %s911_s17, 1 }
  0x33   : > { %s628_s11 = sshll.u32 %s1004_s28, 3  ;;  %s645_s18 = sshll.u32 %s907_s16, 7 }
  0x34   : > { %p1053_p7 = pnand %p1257_p2, %p1256_p1  ;;  %s1062_s22 = scalar_lea.hbm %s1246_s1, %s645_s18 }
  0x35   : > { %s193_s23 = scalar_lea.vmem [#allocation5], %s628_s11  ;;  %s190_s6 = scalar_lea.sflag [#allocation6], %s1004_s28 }
  0x36   : > { %s1258_s7 = scalar_select %p1053_p7, 1, 0 }
  0x37   : > { %s203_s29 = sshll.u32 %s193_s23, 4  ;;  %s763_s8 = scalar_lea.hbm %s1062_s22, 128  ;;  %s204_s29 = int_to_ptr.vmem [resolvable:$true] %s203_s29 }
  0x38   : > { %p764_p9 = scmp.ne.s32.totalorder %s1062_s22, %s763_s8  ;;  %s768_s4 = scalar_lea.hbm %s1246_s1, 256 }
  0x39   : > { %p769_p3 = scmp.lt.u32.totalorder %s1062_s22, %s1246_s1  ;;  %p770_p6 = scmp.lt.u32.totalorder %s768_s4, %s763_s8 }
  0x3a   : > { %p766_p11 = pnand %p764_p9, %p735_p5  ;;  %p772_p10 = scmp.lt.u32.totalorder %s763_s8, %s1062_s22 }
  0x3b   : > { %p771_p4 = por %p770_p6, %p769_p3 }
  0x3c   : > { %p767_p13 = pneg %p766_p11 }
  0x3d   : > { %p773_p12 = por %p772_p10, %p771_p4 }
  0x3f   : > { %p774_p1 = pnand %p773_p12, %p767_p13 }
  0x41   : > { %777 = shalt.err (!%p774_p1)
}
  0x42   : > { %s778_s28 = scalar_lea.vmem %s204_s29, 128  ;;  %s914_s11 = smov [#allocation5]  }
  0x43   : > { %p779_p2 = scmp.ne.s32.totalorder %s204_s29, %s778_s28  ;;  %s783_s19 = sshll.u32 %s914_s11, 4  ;;  %s784_s19 = int_to_ptr.vmem [resolvable:$false] %s783_s19 }
  0x44   : > { %s785_s21 = scalar_lea.vmem %s784_s19, 256  ;;  %p786_p8 = scmp.lt.s32.totalorder %s204_s29, %s784_s19 }
  0x45   : > { %p781_p9 = pnand %p779_p2, %p735_p5  ;;  %p787_p7 = scmp.lt.s32.totalorder %s785_s21, %s778_s28 }
  0x47   : > { %p782_p11 = pneg %p781_p9  ;;  %p788_p3 = por %p787_p7, %p786_p8 }
  0x49   : > { %p789_p6 = pnand %p788_p3, %p782_p11 }
  0x4b   : > { %792 = shalt.err (!%p789_p6)
}
  0x4c   : > { %662 = dma.hbm_to_vmem [thread:$0]  (!%p1017_p0), %s1062_s22, 128, %s204_s29, %s190_s6  }
  0x4d   : > { %p1259_p13 = scmp.ne.s32.totalorder %s1258_s7, 0 }
  0x4e   : > { %s1087_s23 = sand.u32 (!%p1259_p13), 1, %s895_s13   ;;  %p1260_p8 = scmp.ne.s32.totalorder (!%p1259_p13), %s1252_s24, 0 }
  0x4f   : > { %212 = sbr.rel (%p1259_p13) target bundleno = 195 (0xc3), region = 28  ;;  %s1090_s8 = sshll.u32 (!%p1259_p13), %s1087_s23, 1 }
  0x50   : > { %s215_s10 = scalar_lea.sflag (!%p1259_p13), [#allocation3], %s1087_s23  ;;  %s218_s30 = scalar_lea.vmem (!%p1259_p13), [#allocation2], %s1090_s8 }
  0x56   : > { %874 = dma.done.wait (%p1260_p8), %s215_s10, 32  }
  0x57   : > { %876 = vsyncadd (%p1260_p8), %s215_s10, 4294967264  ;;  %s633_s9 = sshll.u32 %s1087_s23, 3  ;;  %s224_s7 = scalar_lea.sflag [#allocation6], %s1087_s23 }
  0x58   : > { %s227_s22 = scalar_lea.vmem [#allocation5], %s633_s9 }
  0x59   : > { %878 = dma.done.wait (%p1260_p8), %s224_s7, 128  }
  0x5a   : > { %880 = vsyncadd (%p1260_p8), %s224_s7, 4294967168  ;;  %v915_v0 = vmov 1966171168   ;;  %v282_v2 = vlaneseq  ;;  %vm299_vm0 = vcmask 1043456   ;;  %v264_v3 = vld [vmem:[%s227_s22] sm:$0xff]  ;;  %v916_v10 = vmov 1  }
  0x5b   : > { %v280_v1 = vunpack.c.l.s4 %v915_v0  ;;  %v297_v6 = vcombine.high %v264_v3, %v264_v3  ;;  %v300_v7 = vsel %vm299_vm0, %v264_v3, -inf  ;;  %v278_v11 = vcombine.low %v916_v10, %v916_v10  ;;  %v265_v25 = vld [vmem:[%s218_s30] sm:$0x3]  ;;  %s252_s24 = scalar_lea.vmem [#allocation7], %s1090_s8  ;;  %s646_s6 = sshll.u32 %s903_s15, 5 }
  0x5c   : > { %v283_v5 = vshrl.u32 %v282_v2, 7  ;;  %v301_v8 = vrot.slane %v300_v7, 4  ;;  %vm275_vm1 = vcmp.ne.s32.totalorder %v265_v25, 255  ;;  %s460_s29 = sshll.u32 %s252_s24, 4  ;;  %vm1138_vm6 = vcmp.lt.s32.totalorder %v282_v2, 256  ;;  %s1149_s18 = scalar_lea.hbm %s1247_s2, %s646_s6  ;;  %s1142_s29 = int_to_ptr.vmem [resolvable:$true] %s460_s29 }
  0x5d   : > { %v281_v4 = vunpack.c.0.s8 %v280_v1  ;;  %v307_v9 = vsel %vm299_vm0, %v297_v6, -inf  ;;  %s259_s28 = scalar_lea.vmem [#allocation8], %s1090_s8  ;;  %s439_s19 = scalar_lea.sflag [#allocation4], %s1087_s23 }
  0x5e   : > { %v302_v13 = vmax.f32 %v300_v7, %v301_v8  ;;  %v308_v14 = vrot.slane %v307_v9, 4  ;;  %v342_v31 = vsub.s32 0, %v283_v5  ;;  %v346_v33 = vsub.s32 1, %v283_v5  ;;  %s1156_s11 = sshll.u32 %s259_s28, 4  ;;  %s793_s21 = scalar_lea.vmem %s1142_s29, 32  ;;  %s1185_s11 = int_to_ptr.vmem [resolvable:$true] %s1156_s11 }
  0x5f   : > { %v1107_v12 = vsub.s32 %v281_v4, %v283_v5  ;;  %p794_p0 = scmp.ne.s32.totalorder %s1142_s29, %s793_s21  ;;  %p1265_p5 = scmp.ne.s32.totalorder %s1253_s25, 0 }
  0x60   : > { %v303_v15 = vrot.slane %v302_v13, 2  ;;  %v309_v16 = vmax.f32 %v307_v9, %v308_v14  ;;  %s917_s10 = smov [#allocation7]  }
  0x61   : > { %v285_v17 = vrot.slane %v278_v11, %v1107_v12  ;;  %p795_p7 = pnand %p794_p0, %p1265_p5  ;;  %s797_s30 = sshll.u32 %s917_s10, 4  ;;  %s798_s30 = int_to_ptr.vmem [resolvable:$false] %s797_s30 }
  0x62   : > { %v304_v18 = vmax.f32 %v302_v13, %v303_v15  ;;  %v310_v19 = vrot.slane %v309_v16, 2  ;;  %s799_s9 = scalar_lea.vmem %s798_s30, 64  ;;  %p800_p10 = scmp.lt.s32.totalorder %s1142_s29, %s798_s30 }
  0x63   : > { %v292_v22 = vrot.slane %v285_v17, %v1107_v12  ;;  %p796_p4 = pneg %p795_p7  ;;  %p801_p12 = scmp.lt.s32.totalorder %s799_s9, %s793_s21 }
  0x64   : > { %v305_v20 = vrot.slane %v304_v18, 1  ;;  %v311_v21 = vmax.f32 %v309_v16, %v310_v19 }
  0x65   : > { %vm293_vm2 = vcmp.ne.s32.totalorder %v292_v22, 0  ;;  %p802_p1 = por %p801_p12, %p800_p10 }
  0x66   : > { %v1111_v23 = vmax.f32 %v304_v18, %v305_v20  ;;  %v312_v24 = vrot.slane %v311_v21, 1  ;;  %vm1119_vm3 = vmand %vm275_vm1, %vm293_vm2 }
  0x67   : > { %v295_v32 = vsel %vm1119_vm3, %v265_v25, 0  ;;  %p803_p2 = pnand %p802_p1, %p796_p4 }
  0x68   : > { %v1115_v26 = vmax.f32 %v311_v21, %v312_v24  ;;  %v343_v34 = vrot.slane %v295_v32, %v342_v31  ;;  %v347_v35 = vrot.slane %v295_v32, %v346_v33 }
  0x6a   : > { %v316_v27 = vcombine.low %v1111_v23, %v1115_v26  ;;  %vm348_vm4 = vcmp.eq.s32.totalorder %v283_v5, %v343_v34  ;;  %vm349_vm5 = vcmp.eq.s32.totalorder %v283_v5, %v347_v35 }
  0x6b   : > { %v350_v37 = vsel %vm348_vm4, %v264_v3, 0.0  ;;  %v351_v42 = vsel %vm349_vm5, %v297_v6, 0.0 }
  0x6c   : > { %v318_v28 = vsub.f32 %v264_v3, %v316_v27  ;;  %v352_v45 = vsel %vm299_vm0, %v350_v37, 0.0  ;;  %v359_v51 = vsel %vm299_vm0, %v351_v42, 0.0 }
  0x6d   : > { %v353_v56 = vrot.slane %v352_v45, 4  ;;  %v360_v60 = vrot.slane %v359_v51, 4 }
  0x6e   : > { %v319_v30 = vmul.f32 1.442695, %v318_v28 }
  0x6f   : > { %v354_v0 = vadd.f32 %v353_v56, %v352_v45  ;;  %v361_v5 = vadd.f32 %v360_v60, %v359_v51 }
  0x70   : > { %723 = vpow2.f32 %v319_v30 }
  0x71   : > { %v355_v8 = vrot.slane %v354_v0, 2  ;;  %v362_v10 = vrot.slane %v361_v5, 2 }
  0x73   : > { %v356_v13 = vadd.f32 %v355_v8, %v354_v0  ;;  %v363_v15 = vadd.f32 %v362_v10, %v361_v5 }
  0x75   : > { %v357_v17 = vrot.slane %v356_v13, 1  ;;  %v364_v20 = vrot.slane %v363_v15, 1 }
  0x77   : > { %v358_v25 = vadd.f32 %v357_v17, %v356_v13  ;;  %v365_v31 = vadd.f32 %v364_v20, %v363_v15 }
  0x7a   : > { %v724_v36 = vpop.eup %723 }
  0x7b   : > { %v322_v38 = vcombine.high %v724_v36, %v724_v36  ;;  %v324_v39 = vsel %vm299_vm0, %v724_v36, 0.0  ;;  %v366_v40 = vsel %vm348_vm4, %v724_v36, 0.0 }
  0x7c   : > { %v325_v41 = vrot.slane %v324_v39, 4  ;;  %v368_v43 = vsel %vm299_vm0, %v366_v40, 0.0 }
  0x7d   : > { %v331_v44 = vsel %vm299_vm0, %v322_v38, 0.0  ;;  %v367_v46 = vsel %vm349_vm5, %v322_v38, 0.0  ;;  %v369_v47 = vrot.slane %v368_v43, 4 }
  0x7e   : > { %v326_v48 = vadd.f32 %v325_v41, %v324_v39  ;;  %v332_v49 = vrot.slane %v331_v44, 4  ;;  %v375_v50 = vsel %vm299_vm0, %v367_v46, 0.0 }
  0x7f   : > { %v370_v52 = vadd.f32 %v369_v47, %v368_v43  ;;  %v376_v53 = vrot.slane %v375_v50, 4 }
  0x80   : > { %v327_v54 = vrot.slane %v326_v48, 2  ;;  %v333_v55 = vadd.f32 %v332_v49, %v331_v44 }
  0x81   : > { %v377_v57 = vadd.f32 %v376_v53, %v375_v50  ;;  %v371_v61 = vrot.slane %v370_v52, 2 }
  0x82   : > { %v328_v58 = vadd.f32 %v327_v54, %v326_v48  ;;  %v334_v59 = vrot.slane %v333_v55, 2 }
  0x83   : > { %v378_v1 = vrot.slane %v377_v57, 2  ;;  %v372_v6 = vadd.f32 %v371_v61, %v370_v52 }
  0x84   : > { %v329_v62 = vrot.slane %v328_v58, 1  ;;  %v335_v63 = vadd.f32 %v334_v59, %v333_v55 }
  0x85   : > { %v379_v9 = vadd.f32 %v378_v1, %v377_v57  ;;  %v373_v11 = vrot.slane %v372_v6, 1 }
  0x86   : > { %v330_v3 = vadd.f32 %v329_v62, %v328_v58  ;;  %v336_v4 = vrot.slane %v335_v63, 1 }
  0x87   : > { %v380_v14 = vrot.slane %v379_v9, 1  ;;  %v374_v16 = vadd.f32 %v373_v11, %v372_v6 }
  0x88   : > { %v337_v7 = vadd.f32 %v336_v4, %v335_v63  ;;  %725 = vrcp.f32 %v330_v3 }
  0x89   : > { %727 = vlog2.f32 %v330_v3  ;;  %v381_v18 = vadd.f32 %v380_v14, %v379_v9 }
  0x8a   : > { %729 = vrcp.f32 %v337_v7 }
  0x8b   : > { %731 = vlog2.f32 %v337_v7 }
  0x92   : > { %v726_v19 = vpop.eup %725 }
  0x93   : > { %v728_v21 = vpop.eup %727  ;;  %v383_v22 = vmul.f32 %v726_v19, %v374_v16 }
  0x94   : > { %v730_v24 = vpop.eup %729  ;;  %v387_v27 = vmul.f32 0.6931472, %v728_v21 }
  0x95   : > { %v732_v28 = vpop.eup %731  ;;  %v385_v30 = vmul.f32 %v730_v24, %v381_v18 }
  0x96   : > { %v389_v32 = vmul.f32 0.6931472, %v732_v28  ;;  %v390_v33 = vadd.f32 %v387_v27, %v1111_v23 }
  0x97   : > { %v396_v34 = vcombine.low %v383_v22, %v385_v30 }
  0x98   : > { %v391_v35 = vadd.f32 %v389_v32, %v1115_v26  ;;  %v392_v36 = vsub.f32 %v390_v33, %v358_v25 }
  0x99   : > { %v403_v37 = vrot.slane %v396_v34, %v1107_v12 }
  0x9a   : > { %v393_v38 = vsub.f32 %v391_v35, %v365_v31 }
  0x9b   : > { %v410_v39 = vrot.slane %v403_v37, %v1107_v12 }
  0x9c   : > { %v420_v23 = vcombine.low %v392_v36, %v393_v38 }
  0x9d   : > { %v412_v26 = vsel %vm1119_vm3, %v410_v39, 2.0 }
  0x9e   : > { %417 = vst.msk [vmem:[%s252_s24] sm:$0x3] %vm1138_vm6, %v412_v26  ;;  %v427_v2 = vrot.slane %v420_v23, %v1107_v12 }
  0x9f   : > { %806 = shalt.err (!%p803_p2)
}
  0xa0   : > { %s807_s7 = scalar_lea.hbm %s1149_s18, 32  ;;  %s811_s4 = scalar_lea.hbm %s1247_s2, 64 }
  0xa1   : > { %p808_p9 = scmp.ne.s32.totalorder %s1149_s18, %s807_s7  ;;  %p812_p6 = scmp.lt.u32.totalorder %s1149_s18, %s1247_s2 }
  0xa2   : > { %p813_p13 = scmp.lt.u32.totalorder %s811_s4, %s807_s7  ;;  %p815_p0 = scmp.lt.u32.totalorder %s807_s7, %s1149_s18 }
  0xa3   : > { %p809_p11 = pnand %p808_p9, %p1265_p5 }
  0xa4   : > { %p814_p8 = por %p813_p13, %p812_p6 }
  0xa5   : > { %p810_p3 = pneg %p809_p11 }
  0xa6   : > { %p816_p7 = por %p815_p0, %p814_p8 }
  0xa8   : > { %p817_p4 = pnand %p816_p7, %p810_p3 }
  0xaa   : > { %820 = shalt.err (!%p817_p4)
}
  0xab   : > { %652 = dma.vmem_to_hbm [thread:$0]  (%p1265_p5), %s1142_s29, 32, %s1149_s18, %s439_s19   ;;  %v434_v41 = vrot.slane %v427_v2, %v1107_v12 }
  0xac   : > { %s1192_s9 = scalar_lea.hbm %s1248_s3, %s646_s6  ;;  %s444_s29 = scalar_lea.sflag [#allocation9], %s1087_s23 }
  0xad   : > { %v436_v42 = vsel %vm1119_vm3, %v434_v41, 0.0  ;;  %s821_s18 = scalar_lea.vmem %s1185_s11, 32  ;;  %s918_s15 = smov [#allocation8]  }
  0xae   : > { %437 = vst.msk [vmem:[%s259_s28] sm:$0x3] %vm1138_vm6, %v436_v42  ;;  %p822_p10 = scmp.ne.s32.totalorder %s1185_s11, %s821_s18  ;;  %s825_s19 = sshll.u32 %s918_s15, 4  ;;  %s826_s19 = int_to_ptr.vmem [resolvable:$false] %s825_s19 }
  0xaf   : > { %s827_s7 = scalar_lea.vmem %s826_s19, 64  ;;  %p828_p2 = scmp.lt.s32.totalorder %s1185_s11, %s826_s19 }
  0xb0   : > { %p823_p12 = pnand %p822_p10, %p1265_p5  ;;  %p829_p9 = scmp.lt.s32.totalorder %s827_s7, %s821_s18 }
  0xb2   : > { %p824_p1 = pneg %p823_p12  ;;  %p830_p11 = por %p829_p9, %p828_p2 }
  0xb4   : > { %p831_p3 = pnand %p830_p11, %p824_p1 }
  0xb6   : > { %834 = shalt.err (!%p831_p3)
}
  0xb7   : > { %s835_s23 = scalar_lea.hbm %s1192_s9, 32  ;;  %s839_s28 = scalar_lea.hbm %s1248_s3, 64 }
  0xb8   : > { %p836_p6 = scmp.ne.s32.totalorder %s1192_s9, %s835_s23  ;;  %p840_p0 = scmp.lt.u32.totalorder %s1192_s9, %s1248_s3 }
  0xb9   : > { %p841_p7 = scmp.lt.u32.totalorder %s839_s28, %s835_s23  ;;  %p843_p10 = scmp.lt.u32.totalorder %s835_s23, %s1192_s9 }
  0xba   : > { %p837_p13 = pnand %p836_p6, %p1265_p5 }
  0xbb   : > { %p842_p4 = por %p841_p7, %p840_p0 }
  0xbc   : > { %p838_p8 = pneg %p837_p13 }
  0xbd   : > { %p844_p12 = por %p843_p10, %p842_p4 }
  0xbf   : > { %p845_p1 = pnand %p844_p12, %p838_p8 }
  0xc1   : > { %848 = shalt.err (!%p845_p1)
}
  0xc2   : > { %653 = dma.vmem_to_hbm [thread:$0]  (%p1265_p5), %s1185_s11, 32, %s1192_s9, %s444_s29  }
  0xc3 PF: > { %s488_s4 = sand.u32 1, %s891_s12   ;;  %p1266_p2 = scmp.ne.s32.totalorder %s1254_s27, 0 }
  0xc4   : > { %p1267_p9 = scmp.ge.s32.totalorder %s911_s17, 2  ;;  %s489_s5 = scalar_lea.sflag [#allocation4], %s488_s4 }
  0xc6   : > { %p664_p11 = pnand %p1267_p9, %p1266_p2 }
  0xc8   : > { %882 = dma.done.wait (!%p664_p11), %s489_s5, 32  }
  0xc9   : > { %884 = vsyncadd (!%p664_p11), %s489_s5, 4294967264  ;;  %s498_s10 = scalar_lea.sflag [#allocation9], %s488_s4 }
  0xca   : > { %886 = dma.done.wait (!%p664_p11), %s498_s10, 32  }
  0xcb   : > { %888 = vsyncadd (!%p664_p11), %s498_s10, 4294967264  ;;  %s26_s17 = sadd.s32 1, %s911_s17   ;;  %s1268_s12 = smov %s895_s13 }
  0xcc   : > { %p23_p3 = scmp.ge.s32.totalorder %s26_s17, 4   ;;  %s1269_s13 = smov %s899_s14 }
  0xcd   : > { %s1270_s14 = smov %s995_s26  ;;  %s1271_s15 = smov %s907_s16 }
  0xce   : > { %s1272_s16 = smov %s1274_s20  ;;  %25 = sbr.rel (!%p23_p3) target bundleno = 10 (0xa), region = 103 }
  0xd5   :  { %503 = vsyncpa [#allocation3], 1 }
  0xd6   :  { %505 = vsyncpa [#allocation3 + $0x1], 1 }
  0xd7   :  { %506 = vsyncpa [#allocation6], 1 }
  0xd8   :  { %508 = vsyncpa [#allocation6 + $0x1], 1 }
  0xd9   :  { %509 = vsyncpa [#allocation4], 1 }
  0xda   :  { %511 = vsyncpa [#allocation4 + $0x1], 1 }
  0xdb   :  { %512 = vsyncpa [#allocation9], 1 }
  0xdc   :  { %514 = vsyncpa [#allocation9 + $0x1], 1 }

</bundles_post_ra>
